<compile_context>
chip_gen: v5e
topology: v5e:2x2
jax: 0.10.0
libtpu: 0.0.40
codegen_flags: <defaults>
</compile_context>

<pallas_src>
import math
import functools

import jax
import jax.numpy as jnp
from jax.experimental import pallas as pl
from jax.experimental.pallas import tpu as pltpu


# ----------------------------- hw-dependent sizing ---------------------------

@functools.lru_cache(maxsize=None)
def _hw_config():
    kind = ""
    try:
        kind = jax.devices()[0].device_kind.lower()
    except Exception:
        pass
    if ("v5" in kind) or ("v6" in kind):
        # 128 MiB physical VMEM: go big on tiles / pipelining depth.
        return {"vmem": 100 * 1024 * 1024, "tm": 512, "tn": 1024, "tk": 2048}
    # v7x (64 MiB VMEM) or unknown generation: conservative sizing.
    return {"vmem": 48 * 1024 * 1024, "tm": 256, "tn": 768, "tk": 1024}


def _pick_tile(total, max_tile, quantum):
    """Largest multiple-of-`quantum` divisor of `total` that is <= max_tile
    (lane-dense, unmasked tiles); falls back to max_tile (masked edge)."""
    if total <= max_tile:
        return total
    t = (max_tile // quantum) * quantum
    while t >= quantum:
        if total % t == 0:
            return t
        t -= quantum
    return max_tile


# ----------------------------- Pallas kernels --------------------------------

def _fused_linear_kernel(*refs, has_ln, has_res, act, eps=1e-6):
    """y = [LN(x)] @ W + b  [-> GELU]  [+ residual]   (K-tiled, f32 accumulate).

    W is pre-transposed to (Cin, Cout) bf16.  When LN is fused the wrapper
    guarantees tk == Cin (full feature dim in one K tile)."""
    x_ref, w_ref, b_ref = refs[0], refs[1], refs[2]
    i = 3
    if has_ln:
        g_ref, be_ref = refs[i], refs[i + 1]
        i += 2
    if has_res:
        r_ref = refs[i]
        i += 1
    o_ref, acc_ref = refs[i], refs[i + 1]

    k = pl.program_id(2)

    @pl.when(k == 0)
    def _():
        acc_ref[...] = jnp.zeros_like(acc_ref)

    if has_ln:
        x = x_ref[...].astype(jnp.float32)
        mu = jnp.mean(x, axis=-1, keepdims=True)
        var = jnp.mean(jnp.square(x - mu), axis=-1, keepdims=True)
        x = (x - mu) * jax.lax.rsqrt(var + jnp.float32(eps))
        x = (x * g_ref[...] + be_ref[...]).astype(jnp.bfloat16)
    else:
        # bf16 activations are fed straight to the MXU (no f32 round trip).
        x = x_ref[...].astype(jnp.bfloat16)

    acc_ref[...] += jnp.dot(x, w_ref[...], preferred_element_type=jnp.float32)

    @pl.when(k == pl.num_programs(2) - 1)
    def _():
        y = acc_ref[...] + b_ref[...]
        if act == "gelu":  # exact erf GELU (matches torch.nn.GELU default)
            y = 0.5 * y * (1.0 + jax.lax.erf(y * jnp.float32(1.0 / math.sqrt(2.0))))
        if has_res:
            y = y + r_ref[...].astype(jnp.float32)
        o_ref[...] = y.astype(o_ref.dtype)


def _layernorm_kernel(x_ref, g_ref, b_ref, o_ref, *, eps):
    x = x_ref[...].astype(jnp.float32)
    mu = jnp.mean(x, axis=-1, keepdims=True)
    var = jnp.mean(jnp.square(x - mu), axis=-1, keepdims=True)
    y = (x - mu) * jax.lax.rsqrt(var + jnp.float32(eps))
    o_ref[...] = (y * g_ref[...] + b_ref[...]).astype(o_ref.dtype)


def _attention_kernel(qkv_ref, o_ref, *, num_heads, head_dim, n_valid):
    """Full-softmax attention for one batch element.

    qkv_ref block: (1, N, 3*D) bf16 with column layout [q | k | v], each D
    laid out head-major — heads are split with static lane slices (no HBM
    transposes).  The softmax scale is already folded into q."""
    qkv = qkv_ref[0]                                   # (N, 3D) bf16
    N = qkv.shape[0]
    D = num_heads * head_dim
    mask_pad = n_valid < N
    if mask_pad:                                       # mask padded key tokens
        kmask = jax.lax.broadcasted_iota(jnp.int32, (N, N), 1) < n_valid

    outs = []
    for h in range(num_heads):                         # static unroll over heads
        c = h * head_dim
        q = qkv[:, c:c + head_dim]                     # (N, hd) bf16 (pre-scaled)
        k = qkv[:, D + c:D + c + head_dim]
        v = qkv[:, 2 * D + c:2 * D + c + head_dim]
        # bf16 x bf16 -> f32 on the MXU; contracting dims (1, 1) == q @ k.T
        s = jax.lax.dot_general(q, k, (((1,), (1,)), ((), ())),
                                preferred_element_type=jnp.float32)   # (N, N)
        if mask_pad:
            s = jnp.where(kmask, s, jnp.float32(-1e30))
        m = jnp.max(s, axis=-1, keepdims=True)
        p = jnp.exp(s - m)
        denom = jnp.sum(p, axis=-1, keepdims=True)
        p = p * pl.reciprocal(denom, approx=True)
        outs.append(jnp.dot(p.astype(jnp.bfloat16), v,
                            preferred_element_type=jnp.float32))      # (N, hd)
    o_ref[0] = jnp.concatenate(outs, axis=-1).astype(o_ref.dtype)     # (N, D)


# ----------------------------- wrappers ---------------------------------------

def fused_linear(x, wT, b, *, gamma=None, beta=None, residual=None,
                 act=None, out_dtype=jnp.float32):
    """x: (M, Cin), wT: (Cin, Cout) bf16, b: (Cout,) f32 -> (M, Cout)."""
    M, Cin = x.shape
    Cout = wT.shape[1]
    has_ln = gamma is not None
    has_res = residual is not None
    hw = _hw_config()

    tm = min(M, hw["tm"])
    if has_ln:
        tk = Cin                     # LN needs the whole feature dim in one K tile
        tn = Cout if Cout <= 4096 else _pick_tile(Cout, hw["tn"], 128)
    else:
        tk = _pick_tile(Cin, hw["tk"], 128)
        tn = _pick_tile(Cout, hw["tn"], 128)
    grid = (pl.cdiv(M, tm), pl.cdiv(Cout, tn), pl.cdiv(Cin, tk))

    in_specs = [
        pl.BlockSpec((tm, tk), lambda m, n, k: (m, k)),   # activations
        pl.BlockSpec((tk, tn), lambda m, n, k: (k, n)),   # weights (const along M)
        pl.BlockSpec((1, tn), lambda m, n, k: (0, n)),    # bias
    ]
    args = [x, wT, b.reshape(1, Cout)]
    if has_ln:
        in_specs += [pl.BlockSpec((1, Cin), lambda m, n, k: (0, 0)),
                     pl.BlockSpec((1, Cin), lambda m, n, k: (0, 0))]
        args += [gamma.reshape(1, Cin), beta.reshape(1, Cin)]
    if has_res:
        in_specs.append(pl.BlockSpec((tm, tn), lambda m, n, k: (m, n)))
        args.append(residual)

    return pl.pallas_call(
        functools.partial(_fused_linear_kernel,
                          has_ln=has_ln, has_res=has_res, act=act),
        out_shape=jax.ShapeDtypeStruct((M, Cout), out_dtype),
        grid=grid,
        in_specs=in_specs,
        out_specs=pl.BlockSpec((tm, tn), lambda m, n, k: (m, n)),
        scratch_shapes=[pltpu.VMEM((tm, tn), jnp.float32)],
        compiler_params=pltpu.CompilerParams(
            dimension_semantics=("parallel", "parallel", "arbitrary"),
            vmem_limit_bytes=hw["vmem"]),
    )(*args)


def layernorm(x, gamma, beta, eps=1e-6):
    """x: (M, C), gamma/beta: (C,) -> (M, C)."""
    M, C = x.shape
    hw = _hw_config()
    tm = min(M, hw["tm"]) if M % 8 == 0 else M
    return pl.pallas_call(
        functools.partial(_layernorm_kernel, eps=eps),
        out_shape=jax.ShapeDtypeStruct((M, C), x.dtype),
        grid=(pl.cdiv(M, tm),),
        in_specs=[pl.BlockSpec((tm, C), lambda i: (i, 0)),
                  pl.BlockSpec((1, C), lambda i: (0, 0)),
                  pl.BlockSpec((1, C), lambda i: (0, 0))],
        out_specs=pl.BlockSpec((tm, C), lambda i: (i, 0)),
        compiler_params=pltpu.CompilerParams(
            dimension_semantics=("parallel",),
            vmem_limit_bytes=hw["vmem"]),
    )(x, gamma.reshape(1, C), beta.reshape(1, C))


def attention(qkv3, num_heads, head_dim, n_valid):
    """qkv3: (B, N, 3*D) bf16 -> (B, N, D) bf16; grid over batch."""
    B, N, C3 = qkv3.shape
    D = num_heads * head_dim
    hw = _hw_config()
    # TODO(synk): for long sequences (N >~ 512) on v7x switch to a kv-tiled
    # online-softmax (flash-style) variant to bound the (N, N) score footprint.
    return pl.pallas_call(
        functools.partial(_attention_kernel, num_heads=num_heads,
                          head_dim=head_dim, n_valid=n_valid),
        out_shape=jax.ShapeDtypeStruct((B, N, D), jnp.bfloat16),
        grid=(B,),
        in_specs=[pl.BlockSpec((1, N, C3), lambda b: (b, 0, 0))],
        out_specs=pl.BlockSpec((1, N, D), lambda b: (b, 0, 0)),
        compiler_params=pltpu.CompilerParams(
            dimension_semantics=("parallel",),
            vmem_limit_bytes=hw["vmem"]),
    )(qkv3)


# ----------------------------- params -----------------------------------------

def init_params(key, cfg):
    D = cfg["embed_dim"]; C = cfg["in_chans"]; ps = cfg["patch_size"]
    depth = cfg["depth"]; r = cfg["rank"]
    Hmlp = int(D * cfg["mlp_ratio"])
    npat = (cfg["img_size"] // ps) ** 2
    keys = iter(jax.random.split(key, 4 + depth * 20))

    def nrm(shape, s=0.02):
        return jax.random.normal(next(keys), shape, jnp.float32) * s

    params = {
        "patch_w": nrm((D, C, ps, ps)), "patch_b": nrm((D,)),
        "cls": nrm((1, 1, D)), "pos": nrm((1, npat + 1, D)),
        "norm_g": jnp.ones((D,), jnp.float32), "norm_b": jnp.zeros((D,), jnp.float32),
        "blocks": [],
    }
    scaling = 1.0 / r  # lora_alpha=1 -> scaling = alpha / r
    for _ in range(depth):
        blk = {"scaling": scaling,
               "norm1_g": jnp.ones((D,), jnp.float32), "norm1_b": jnp.zeros((D,), jnp.float32),
               "norm2_g": jnp.ones((D,), jnp.float32), "norm2_b": jnp.zeros((D,), jnp.float32)}
        for name in ("q", "k", "v", "proj"):
            blk[name + "_w"] = nrm((D, D))
            blk[name + "_b"] = nrm((D,))
            blk[name + "_A"] = nrm((r, D))
            # torch zero-inits lora_B; small non-zero values are used here so
            # the LoRA branch is actually exercised numerically.
            blk[name + "_B"] = nrm((D, r))
        blk["fc1_w"] = nrm((Hmlp, D)); blk["fc1_b"] = nrm((Hmlp,))
        blk["fc2_w"] = nrm((D, Hmlp)); blk["fc2_b"] = nrm((D,))
        params["blocks"].append(blk)
    return params


def fold_params(params, cfg):
    """One-time prep: merge LoRA into W, fuse q/k/v (with the attention scale
    folded into q), pre-transpose, and cast weights to bf16."""
    D = cfg["embed_dim"]
    heads = cfg["num_heads"]
    scale = (D // heads) ** (-0.5)
    folded = {
        "pe_wT": params["patch_w"].reshape(D, -1).T.astype(jnp.bfloat16),
        "pe_b": params["patch_b"],
        "cls": params["cls"], "pos": params["pos"],
        "norm_g": params["norm_g"], "norm_b": params["norm_b"],
        "blocks": [],
    }
    for blk in params["blocks"]:
        s = blk["scaling"]

        def merged(name):
            # identical to the unmerged forward: F.linear(x,W,b) + x A^T B^T * s
            return blk[name + "_w"] + s * (blk[name + "_B"] @ blk[name + "_A"])

        # softmax(scale * qk^T) == softmax((scale*q) k^T): fold scale into q.
        w_qkv = jnp.concatenate([merged("q") * scale, merged("k"), merged("v")],
                                axis=0)                                  # (3D, D)
        b_qkv = jnp.concatenate([blk["q_b"] * scale, blk["k_b"], blk["v_b"]], axis=0)
        folded["blocks"].append({
            "qkv_wT": w_qkv.T.astype(jnp.bfloat16), "qkv_b": b_qkv,
            "proj_wT": merged("proj").T.astype(jnp.bfloat16), "proj_b": blk["proj_b"],
            "fc1_wT": blk["fc1_w"].T.astype(jnp.bfloat16), "fc1_b": blk["fc1_b"],
            "fc2_wT": blk["fc2_w"].T.astype(jnp.bfloat16), "fc2_b": blk["fc2_b"],
            "norm1_g": blk["norm1_g"], "norm1_b": blk["norm1_b"],
            "norm2_g": blk["norm2_g"], "norm2_b": blk["norm2_b"],
        })
    return folded


# ----------------------------- model -------------------------------------------

def vit_forward(x_img, fp, cfg):
    """x_img: (B, C, H, W) NCHW. Returns (B, embed_dim) cls-token features."""
    B = x_img.shape[0]
    ps = cfg["patch_size"]; C = cfg["in_chans"]
    Himg = Wimg = cfg["img_size"]
    D = cfg["embed_dim"]; heads = cfg["num_heads"]; hd = D // heads
    gh, gw = Himg // ps, Wimg // ps
    npat = gh * gw

    # --- patch embed: Conv2d(k=ps, s=ps) == patchify + matmul ---
    patches = x_img.reshape(B, C, gh, ps, gw, ps).transpose(0, 2, 4, 1, 3, 5)
    patches = patches.reshape(B * npat, C * ps * ps)
    tokens = fused_linear(patches, fp["pe_wT"], fp["pe_b"]).reshape(B, npat, D)

    # cls token + pos embed (pos_drop identity at eval, drop_rate=0)
    cls = jnp.broadcast_to(fp["cls"], (B, 1, D))
    x = jnp.concatenate([cls, tokens], axis=1) + fp["pos"]
    n_valid = npat + 1
    N = ((n_valid + 7) // 8) * 8                   # sublane-align the token count
    x = jnp.pad(x, ((0, 0), (0, N - n_valid), (0, 0)))
    x2 = x.reshape(B * N, D)                       # f32 residual stream

    for blk in fp["blocks"]:
        # --- attention (LN1 fused into the qkv projection; bf16 intermediates) ---
        qkv = fused_linear(x2, blk["qkv_wT"], blk["qkv_b"],
                           gamma=blk["norm1_g"], beta=blk["norm1_b"],
                           out_dtype=jnp.bfloat16)             # (B*N, 3D) bf16
        ao = attention(qkv.reshape(B, N, 3 * D), heads, hd, n_valid)   # (B,N,D) bf16
        x2 = fused_linear(ao.reshape(B * N, D), blk["proj_wT"], blk["proj_b"],
                          residual=x2)                          # f32 residual

        # --- MLP (LN2 fused into fc1, exact erf GELU, residual fused into fc2) ---
        h = fused_linear(x2, blk["fc1_wT"], blk["fc1_b"],
                         gamma=blk["norm2_g"], beta=blk["norm2_b"],
                         act="gelu", out_dtype=jnp.bfloat16)
        x2 = fused_linear(h, blk["fc2_wT"], blk["fc2_b"], residual=x2)

    # final norm (global_pool=False branch); LN is per-token so norm(x)[:,0] ==
    # norm(x[:,0]) — only normalize the cls rows.
    cls_tok = x2.reshape(B, N, D)[:, 0]
    return layernorm(cls_tok, fp["norm_g"], fp["norm_b"], eps=1e-6)


# ----------------------------- main ---------------------------------------------

if __name__ == "__main__":
    # small shapes consistent with the module's forward:
    # img 16x16, patch 8 -> 4 patches + 1 cls token = 5 tokens (padded to 8),
    # embed_dim 32, 4 heads, depth 2, LoRA rank 4, qkv_bias=True,
    # vpt_on=False, global_pool=False, distilled=False.
    # TODO(synk): vpt_on / distilled / pre_logits / head branches are not exercised
    # (they are off in the default forward path); dropouts are identity at eval.
    cfg = dict(img_size=16, patch_size=8, in_chans=3, embed_dim=32, depth=2,
               num_heads=4, mlp_ratio=4.0, rank=4)

    key = jax.random.PRNGKey(0)
    k_param, k_x = jax.random.split(key)
    params = init_params(k_param, cfg)
    folded = fold_params(params, cfg)
    x = jax.random.normal(k_x, (2, cfg["in_chans"], cfg["img_size"], cfg["img_size"]),
                          jnp.float32)

    out = vit_forward(x, folded, cfg)
    out = jax.block_until_ready(out)
    assert out.shape == (2, cfg["embed_dim"]) and bool(jnp.all(jnp.isfinite(out)))
    print("KERNEL_OK")
</pallas_src>

<mosaic_0001>
module attributes {stable_mosaic.version = 11 : i64} {
  func.func @_fused_linear_kernel(%arg0: i32, %arg1: i32, %arg2: i32, %arg3: memref<8x192xf32, #tpu.memory_space<vmem>>, %arg4: memref<192x32xbf16, #tpu.memory_space<vmem>>, %arg5: memref<1x32xf32, #tpu.memory_space<vmem>>, %arg6: memref<8x32xf32, #tpu.memory_space<vmem>>, %arg7: memref<8x32xf32, #tpu.memory_space<vmem>>) attributes {dimension_semantics = [#tpu.dimension_semantics<parallel>, #tpu.dimension_semantics<parallel>, #tpu.dimension_semantics<arbitrary>], iteration_bounds = array<i64: 1, 1, 1>, scalar_prefetch = 0 : i64, scratch_operands = 1 : i64, tpu.core_type = #tpu.core_type<tc>, window_params = [{transform_indices = @transform_0, window_bounds = array<i64: 8, 192>}, {transform_indices = @transform_1, window_bounds = array<i64: 192, 32>}, {transform_indices = @transform_2, window_bounds = array<i64: 1, 32>}, {transform_indices = @transform_3, window_bounds = array<i64: 8, 32>}]} {
    %c0_i32 = arith.constant 0 : i32
    %0 = arith.cmpi eq, %arg2, %c0_i32 : i32
    %1 = arith.extui %0 : i1 to i32
    %c0_i32_0 = arith.constant 0 : i32
    %2 = arith.cmpi ne, %1, %c0_i32_0 : i32
    scf.if %2 {
      %cst_10 = arith.constant 0.000000e+00 : f32
      %13 = vector.broadcast %cst_10 : f32 to vector<8x32xf32>
      %c0_11 = arith.constant 0 : index
      %c0_12 = arith.constant 0 : index
      %14 = vector.load %arg7[%c0_11, %c0_12] : memref<8x32xf32, #tpu.memory_space<vmem>>, vector<8x32xf32>
      tpu.vector_store %arg7[%c0_11, %c0_12], %13 {strides = array<i32>} : memref<8x32xf32, #tpu.memory_space<vmem>>, vector<8x32xf32>,
    } else {
    }
    %c0 = arith.constant 0 : index
    %c0_1 = arith.constant 0 : index
    %3 = vector.load %arg3[%c0, %c0_1] : memref<8x192xf32, #tpu.memory_space<vmem>>, vector<8x192xf32>
    %4 = arith.truncf %3 : vector<8x192xf32> to vector<8x192xbf16>
    %c0_2 = arith.constant 0 : index
    %c0_3 = arith.constant 0 : index
    %5 = vector.load %arg7[%c0_2, %c0_3] : memref<8x32xf32, #tpu.memory_space<vmem>>, vector<8x32xf32>
    %c0_4 = arith.constant 0 : index
    %c0_5 = arith.constant 0 : index
    %6 = vector.load %arg4[%c0_4, %c0_5] : memref<192x32xbf16, #tpu.memory_space<vmem>>, vector<192x32xbf16>
    %cst = arith.constant dense<0.000000e+00> : vector<8x32xf32>
    %7 = tpu.matmul %4, %6, %cst {dimension_numbers = #tpu.dot_dimension_numbers<[1], [0], [0], [1], [0, 0, 1, 1], [], []>} : vector<8x192xbf16>, vector<192x32xbf16>, vector<8x32xf32> -> vector<8x32xf32>
    %8 = arith.addf %5, %7 : vector<8x32xf32>
    %c0_6 = arith.constant 0 : index
    %c0_7 = arith.constant 0 : index
    %9 = vector.load %arg7[%c0_6, %c0_7] : memref<8x32xf32, #tpu.memory_space<vmem>>, vector<8x32xf32>
    tpu.vector_store %arg7[%c0_6, %c0_7], %8 {strides = array<i32>} : memref<8x32xf32, #tpu.memory_space<vmem>>, vector<8x32xf32>,
    %c0_i32_8 = arith.constant 0 : i32
    %10 = arith.cmpi eq, %arg2, %c0_i32_8 : i32
    %11 = arith.extui %10 : i1 to i32
    %c0_i32_9 = arith.constant 0 : i32
    %12 = arith.cmpi ne, %11, %c0_i32_9 : i32
    scf.if %12 {
      %c0_10 = arith.constant 0 : index
      %c0_11 = arith.constant 0 : index
      %13 = vector.load %arg7[%c0_10, %c0_11] : memref<8x32xf32, #tpu.memory_space<vmem>>, vector<8x32xf32>
      %c0_12 = arith.constant 0 : index
      %c0_13 = arith.constant 0 : index
      %14 = vector.load %arg5[%c0_12, %c0_13] : memref<1x32xf32, #tpu.memory_space<vmem>>, vector<1x32xf32>
      %15 = vector.broadcast %14 : vector<1x32xf32> to vector<8x32xf32>
      %16 = arith.addf %13, %15 : vector<8x32xf32>
      %c0_14 = arith.constant 0 : index
      %c0_15 = arith.constant 0 : index
      %17 = vector.load %arg6[%c0_14, %c0_15] : memref<8x32xf32, #tpu.memory_space<vmem>>, vector<8x32xf32>
      tpu.vector_store %arg6[%c0_14, %c0_15], %16 {strides = array<i32>} : memref<8x32xf32, #tpu.memory_space<vmem>>, vector<8x32xf32>,
    } else {
    }
    return
  }
  func.func @transform_0(%arg0: i32, %arg1: i32, %arg2: i32) -> (i32, i32) {
    %c0_i32 = arith.constant 0 : i32
    return %arg0, %arg2 : i32, i32
  }
  func.func @transform_1(%arg0: i32, %arg1: i32, %arg2: i32) -> (i32, i32) {
    %c0_i32 = arith.constant 0 : i32
    return %arg2, %arg1 : i32, i32
  }
  func.func @transform_2(%arg0: i32, %arg1: i32, %arg2: i32) -> (i32, i32) {
    %c0_i32 = arith.constant 0 : i32
    %c0_i32_0 = arith.constant 0 : i32
    return %c0_i32, %arg1 : i32, i32
  }
  func.func @transform_3(%arg0: i32, %arg1: i32, %arg2: i32) -> (i32, i32) {
    %c0_i32 = arith.constant 0 : i32
    return %arg0, %arg1 : i32, i32
  }
}

</mosaic_0001>

<bundles_post_ra>
// kernel: tpu_custom_call.1
= control target key start
LH: loop header
LB: loop body
LE: loop exit
PB: predicated region body
PF: predicated region fallthrough
CT: control target
= control target key end

     0   :  { %s345_s0 = inlined_call_operand.vmem [shape: f32[8,192], index: 0, kind: input, shape index: {}]   ;;  %s346_s1 = inlined_call_operand.vmem [shape: bf16[192,32], index: 1, kind: input, shape index: {}]   ;;  %s347_s2 = inlined_call_operand.vmem [shape: f32[1,32], index: 2, kind: input, shape index: {}]   ;;  %s348_s3 = inlined_call_operand.hbm [shape: f32[8,32], index: 3, kind: output, shape index: {}]  }
   0x1   :  { %v238_v0 = vld [vmem:[%s346_s1 + $0x38] sm:$0xff]  ;;  %v237_v2 = vld [vmem:[%s346_s1 + $0x30] sm:$0xff] }
   0x2   :  { %v242_v1 = vld [vmem:[%s346_s1 + $0x58] sm:$0xff]  ;;  %127 = vmatpush.bf16.msra.mxu0 %v238_v0  ;;  %v241_v3 = vld [vmem:[%s346_s1 + $0x50] sm:$0xff] }
   0x3   :  { %144 = vmatpush.bf16.msra.mxu1 %v242_v1 }
   0x4   :  { %8 = vsyncpa [#allocation4], 0  ;;  %v236_v4 = vld [vmem:[%s346_s1 + $0x28] sm:$0xff]  ;;  %v235_v6 = vld [vmem:[%s346_s1 + $0x20] sm:$0xff]  ;;  %vm123_vm0 = vcmask 523264   ;;  %vm20_vm1 = vcmask 261120  }
   0x5   :  { %v240_v5 = vld [vmem:[%s346_s1 + $0x48] sm:$0xff]  ;;  %v239_v7 = vld [vmem:[%s346_s1 + $0x40] sm:$0xff]  ;;  %v234_v9 = vld [vmem:[%s346_s1 + $0x18] sm:$0xff]  ;;  %v272_v16 = vmov 0.0   ;;  %s173_s17 = sshll.u32 %s348_s3, 4  ;;  %s174_s17 = int_to_ptr.hbm [resolvable:$true] %s173_s17 }
   0x6   :  { %128 = vmatpush.bf16.msra.mxu0 %v237_v2  ;;  %v23_v8 = vld [vmem:[%s345_s0 + $0x8] sm:$0xff]  ;;  %v233_v11 = vld [vmem:[%s346_s1 + $0x10] sm:$0xff]  ;;  %v231_v13 = vld [vmem:[%s346_s1] sm:$0xff]  ;;  %21 = vst.msk [vmem:[#allocation2] sm:$0xff] %vm20_vm1, %v272_v16 }
   0x7   :  { %145 = vmatpush.bf16.msra.mxu1 %v241_v3  ;;  %v25_v10 = vpack.c.bf16 %v23_v8, %v23_v8  ;;  %v232_v12 = vld [vmem:[%s346_s1 + $0x8] sm:$0xff]  ;;  %v22_v14 = vld [vmem:[%s345_s0] sm:$0xff]  ;;  %s273_s0 = smov [#allocation3]  }
   0x8   :  { %v24_v15 = vpack.c.bf16 %v22_v14, %v22_v14  ;;  %v245_v24 = vld [vmem:[%s347_s2] ss:$0 sm:$0xff]  ;;  %s171_s14 = sshll.u32 %s273_s0, 4  ;;  %s172_s14 = int_to_ptr.vmem [resolvable:$true] %s171_s14 }
   0xa   :  { %129 = vmatpush.bf16.msra.mxu0 %v236_v4 }
   0xb   :  { %146 = vmatpush.bf16.msra.mxu1 %v240_v5 }
   0xd   :  { %v26_v19 = vld [vmem:[#allocation2] sm:$0xff] }
   0xe   :  { %130 = vmatpush.bf16.msra.mxu0 %v235_v6 }
   0xf   :  { %147 = vmatpush.bf16.msra.mxu1 %v239_v7 }
  0x12   :  { %131 = vmatpush.bf16.msra.mxu0 %v234_v9  ;;  %230 = vmatmul.msk.bf16.vlgmr.msra.gmra.mxu1 %vm123_vm0, %v25_v10 }
  0x16   :  { %132 = vmatpush.bf16.msra.mxu0 %v233_v11 }
  0x1a   :  { %133 = vmatpush.bf16.msra.mxu0 %v232_v12 }
  0x1e   :  { %134 = vmatpush.bf16.msra.mxu0 %v231_v13 }
  0x21   :  { %135 = vmatmul.bf16.vlgmr.msra.gmra.mxu0 %v24_v15 }
  0x8f   :  { %v149_v17 = vpop.f32.mrf.mxu1 }
  0x97   :  { %v151_v18 = vpop.f32.mrf.mxu1 }
  0x9e   :  { %v136_v20 = vpop.f32.mrf.mxu0 }
  0x9f   :  { %v150_v21 = vadd.f32 %v149_v17, %v136_v20 }
  0xa1   :  { %v153_v22 = vadd.f32 %v150_v21, %v26_v19 }
  0xa3   :  { %155 = vst.msk [vmem:[#allocation2] sm:$0xff] %vm20_vm1, %v153_v22 }
  0xa6   :  { %v138_v23 = vpop.f32.mrf.mxu0 }
  0xaa   :  { %v159_v25 = vld [vmem:[#allocation2] sm:$0xff] }
  0xab   :  { %v164_v26 = vadd.f32 %v245_v24, %v159_v25 }
  0xad   :  { %165 = vst.msk [vmem:[#allocation3] sm:$0xff] %vm20_vm1, %v164_v26 }
  0xae   :  { %176 = dma.vmem_to_hbm [thread:$0]  %s172_s14, 128, %s174_s17, [#allocation4]  }
  0xaf   :  { %270 = dma.done.wait [#allocation4], 128  }
  0xb0   :  { %271 = vsyncadd [#allocation4], 4294967168 }
  0xb1   :  { %181 = vsyncpa [#allocation4], 1 }

</bundles_post_ra>
